<compile_context>
chip_gen: v6e
topology: v6e:2x2x1
jax: 0.10.0
libtpu: 0.0.40
codegen_flags: <defaults>
</compile_context>

<pallas_src>
import math

import jax
import jax.numpy as jnp
from jax.experimental import pallas as pl
from jax.experimental.pallas import tpu as pltpu

EPS = 1e-5  # torch.nn.functional.layer_norm default eps


def _round_up(a, b):
    return ((a + b - 1) // b) * b


def _make_kernel_plain(eps):
    """LayerNorm over a (tr, dim) tile (dim already lane-friendly or fallback path)."""

    def kernel(x_ref, gamma_ref, o_ref):
        x = x_ref[...].astype(jnp.float32)          # (tr, dim)
        g = gamma_ref[...].astype(jnp.float32)      # (1, dim)
        mean = jnp.mean(x, axis=-1, keepdims=True)
        xc = x - mean
        var = jnp.mean(xc * xc, axis=-1, keepdims=True)  # biased (torch semantics)
        o_ref[...] = (xc * (jax.lax.rsqrt(var + eps) * g)).astype(o_ref.dtype)

    return kernel


def _make_kernel_grouped(group, dim, eps):
    """LayerNorm over a (tr, W=group*dim) lane-dense slab.

    `group` logical rows are packed along the 128-lane axis. Per-segment mean/var are
    computed with a factored segment-sum: dot(x, S[W,group]) -> (tr, group), then a
    (tr,group) x (group,W) broadcast matmul. S contains exact 0/1 values, so the
    result is numerically identical to a direct per-segment reduction in f32.
    """
    inv_dim = 1.0 / float(dim)

    def kernel(x_ref, gamma_ref, s_ref, st_ref, o_ref):
        x = x_ref[...].astype(jnp.float32)          # (tr, W)
        g = gamma_ref[...].astype(jnp.float32)      # (1, W)
        S = s_ref[...]                               # (W, group) f32, 0/1
        ST = st_ref[...]                             # (group, W) f32, 0/1
        # Segment sums / means on the narrow (tr, group) shape.
        sums = jnp.dot(x, S, preferred_element_type=jnp.float32)          # (tr, group)
        mean_s = sums * inv_dim
        mean = jnp.dot(mean_s, ST, preferred_element_type=jnp.float32)    # (tr, W)
        xc = x - mean
        var_s = jnp.dot(xc * xc, S, preferred_element_type=jnp.float32) * inv_dim
        inv_std_s = jax.lax.rsqrt(var_s + eps)                            # (tr, group)
        inv_std = jnp.dot(inv_std_s, ST, preferred_element_type=jnp.float32)  # (tr, W)
        o_ref[...] = (xc * inv_std * g).astype(o_ref.dtype)

    return kernel


def layer_norm(x, gamma, *, eps=EPS, target_block_bytes=8 * 1024 * 1024):
    """LayerNorm over the last dim, no bias (beta = 0)."""
    orig_shape = x.shape
    dim = orig_shape[-1]
    rows = math.prod(orig_shape[:-1])
    itemsize = jnp.dtype(x.dtype).itemsize

    # Sublane packing: 8 rows/vreg for 4-byte dtypes, 16 for 2-byte, 32 for 1-byte.
    sub = max(8, 32 // itemsize)

    # Lane-dense packing: fold `group` logical rows into the lane axis whenever
    # W = group*dim is a modest multiple of 128 (keeps every load/store unmasked).
    if dim % 128 == 0:
        group = 1
    else:
        lcm = dim * 128 // math.gcd(dim, 128)
        if lcm <= 2048 and lcm // dim <= 64:
            group = lcm // dim
        else:
            group = 1
            # TODO(synk): dims with a huge lcm(dim,128) fall back to a full-dim
            # (masked-store) lane layout instead of a padded-lane fast path.
    W = group * dim

    # Only a group-alignment pad (tiny, and only when group > 1 and rows % group != 0).
    rows_aligned = _round_up(rows, group)
    packed_rows = rows_aligned // group

    # Generation-aware VMEM budget with headroom (v7x has 64 MiB per TensorCore).
    try:
        vmem_cap = int(pltpu.get_tpu_info().vmem_capacity_bytes)
    except Exception:
        vmem_cap = 64 * 1024 * 1024  # conservative (v7x)
    vmem_budget = min(40 * 1024 * 1024, vmem_cap - 20 * 1024 * 1024)

    # Bytes/row: double-buffered in+out tiles + ~6 live f32 (tr, W) temporaries.
    per_row_bytes = W * (4 * itemsize + 6 * 4)
    cap = max(sub, (vmem_budget // per_row_bytes) // sub * sub)

    # Row-tile: big enough to hide per-step overhead behind HBM DMA, small enough
    # to fit the VMEM budget, and >= 4 grid steps (>= 2 per core on v7x) when possible.
    tr = max(sub, target_block_bytes // (2 * W * itemsize))
    tr = min(tr, cap)
    if packed_rows >= 4 * sub:
        tr = min(tr, _round_up(pl.cdiv(packed_rows, 4), sub))
    tr = max(sub, (tr // sub) * sub)
    if packed_rows < tr:
        tr = packed_rows  # full-extent block for small inputs (any size allowed)
    grid = (pl.cdiv(packed_rows, tr),)

    # Pack lanes (free contiguous reshape; pad only for group alignment).
    x2 = x.reshape(rows, dim)
    if rows_aligned != rows:
        x2 = jnp.pad(x2, ((0, rows_aligned - rows), (0, 0)))
    xp = x2.reshape(packed_rows, W)

    gamma_row = gamma.reshape(1, dim)
    gamma_p = jnp.tile(gamma_row, (1, group)) if group > 1 else gamma_row  # (1, W)

    # Explicit VMEM limit: double-buffered io tiles + f32 temps + small constants + slack.
    est = tr * W * (4 * itemsize + 6 * 4) + 4 * W * 4 + (1 << 20)
    vmem_limit = int(
        max(16 * 1024 * 1024,
            min(vmem_cap - 12 * 1024 * 1024,
                _round_up(est, 1 << 20) + 8 * 1024 * 1024))
    )

    if group > 1:
        # Segment-indicator matrices, built once (exact 0/1 values).
        seg = jnp.arange(W, dtype=jnp.int32) // dim                       # (W,)
        S = (seg[:, None] == jnp.arange(group, dtype=jnp.int32)[None, :]
             ).astype(jnp.float32)                                        # (W, group)
        ST = S.T                                                          # (group, W)
        kernel = _make_kernel_grouped(group, dim, eps)
        in_specs = [
            pl.BlockSpec((tr, W), lambda i: (i, 0)),
            pl.BlockSpec((1, W), lambda i: (0, 0)),
            pl.BlockSpec((W, group), lambda i: (0, 0)),
            pl.BlockSpec((group, W), lambda i: (0, 0)),
        ]
        operands = (xp, gamma_p, S, ST)
    else:
        kernel = _make_kernel_plain(eps)
        in_specs = [
            pl.BlockSpec((tr, W), lambda i: (i, 0)),
            pl.BlockSpec((1, W), lambda i: (0, 0)),
        ]
        operands = (xp, gamma_p)

    out = pl.pallas_call(
        kernel,
        out_shape=jax.ShapeDtypeStruct((packed_rows, W), x.dtype),
        grid_spec=pltpu.PrefetchScalarGridSpec(
            num_scalar_prefetch=0,
            grid=grid,
            in_specs=in_specs,
            out_specs=pl.BlockSpec((tr, W), lambda i: (i, 0)),
        ),
        compiler_params=pltpu.CompilerParams(
            dimension_semantics=("parallel",),
            vmem_limit_bytes=vmem_limit,
        ),
    )(*operands)

    out = out.reshape(rows_aligned, dim)
    if rows_aligned != rows:
        out = out[:rows]
    return out.reshape(orig_shape)


if __name__ == "__main__":
    batch, seq, hidden = 2, 8, 32
    key = jax.random.PRNGKey(0)
    x = jax.random.normal(key, (batch, seq, hidden), dtype=jnp.float32)

    # Deterministic params matching the nn.Module __init__:
    # gamma = ones(dim) (parameter), beta = zeros(dim) (buffer, identically 0).
    gamma = jnp.ones((hidden,), dtype=jnp.float32)

    y = layer_norm(x, gamma)
    jax.block_until_ready(y)

    # Pure-JAX reference check.
    mean = jnp.mean(x, axis=-1, keepdims=True)
    var = jnp.mean((x - mean) ** 2, axis=-1, keepdims=True)
    ref = (x - mean) * jax.lax.rsqrt(var + EPS) * gamma
    assert jnp.allclose(y, ref, atol=1e-5, rtol=1e-5), float(jnp.max(jnp.abs(y - ref)))

    print("KERNEL_OK")
</pallas_src>

<mosaic_0001>
module attributes {stable_mosaic.version = 11 : i64} {
  func.func @kernel(%arg0: i32, %arg1: memref<4x128xf32, #tpu.memory_space<vmem>>, %arg2: memref<1x128xf32, #tpu.memory_space<vmem>>, %arg3: memref<128x4xf32, #tpu.memory_space<vmem>>, %arg4: memref<4x128xf32, #tpu.memory_space<vmem>>, %arg5: memref<4x128xf32, #tpu.memory_space<vmem>>) attributes {dimension_semantics = [#tpu.dimension_semantics<parallel>], iteration_bounds = array<i64: 1>, scalar_prefetch = 0 : i64, scratch_operands = 0 : i64, tpu.core_type = #tpu.core_type<tc>, window_params = [{transform_indices = @transform_0, window_bounds = array<i64: 4, 128>}, {pipeline_mode = #tpu.pipeline_mode<synchronous>, transform_indices = @transform_1, window_bounds = array<i64: 1, 128>}, {pipeline_mode = #tpu.pipeline_mode<synchronous>, transform_indices = @transform_2, window_bounds = array<i64: 128, 4>}, {pipeline_mode = #tpu.pipeline_mode<synchronous>, transform_indices = @transform_3, window_bounds = array<i64: 4, 128>}, {transform_indices = @transform_4, window_bounds = array<i64: 4, 128>}]} {
    %c0 = arith.constant 0 : index
    %c0_0 = arith.constant 0 : index
    %0 = vector.load %arg1[%c0, %c0_0] : memref<4x128xf32, #tpu.memory_space<vmem>>, vector<4x128xf32>
    %c0_1 = arith.constant 0 : index
    %c0_2 = arith.constant 0 : index
    %1 = vector.load %arg2[%c0_1, %c0_2] : memref<1x128xf32, #tpu.memory_space<vmem>>, vector<1x128xf32>
    %c0_3 = arith.constant 0 : index
    %c0_4 = arith.constant 0 : index
    %2 = vector.load %arg3[%c0_3, %c0_4] : memref<128x4xf32, #tpu.memory_space<vmem>>, vector<128x4xf32>
    %c0_5 = arith.constant 0 : index
    %c0_6 = arith.constant 0 : index
    %3 = vector.load %arg4[%c0_5, %c0_6] : memref<4x128xf32, #tpu.memory_space<vmem>>, vector<4x128xf32>
    %cst = arith.constant dense<0.000000e+00> : vector<4x4xf32>
    %4 = tpu.matmul %0, %2, %cst {dimension_numbers = #tpu.dot_dimension_numbers<[1], [0], [0], [1], [0, 0, 1, 1], [], []>} : vector<4x128xf32>, vector<128x4xf32>, vector<4x4xf32> -> vector<4x4xf32>
    %cst_7 = arith.constant 3.125000e-02 : f32
    %5 = vector.broadcast %cst_7 : f32 to vector<4x4xf32>
    %6 = arith.mulf %4, %5 : vector<4x4xf32>
    %cst_8 = arith.constant dense<0.000000e+00> : vector<4x128xf32>
    %7 = tpu.matmul %6, %3, %cst_8 {dimension_numbers = #tpu.dot_dimension_numbers<[1], [0], [0], [1], [0, 0, 1, 1], [], []>} : vector<4x4xf32>, vector<4x128xf32>, vector<4x128xf32> -> vector<4x128xf32>
    %8 = arith.subf %0, %7 : vector<4x128xf32>
    %9 = arith.mulf %8, %8 : vector<4x128xf32>
    %cst_9 = arith.constant dense<0.000000e+00> : vector<4x4xf32>
    %10 = tpu.matmul %9, %2, %cst_9 {dimension_numbers = #tpu.dot_dimension_numbers<[1], [0], [0], [1], [0, 0, 1, 1], [], []>} : vector<4x128xf32>, vector<128x4xf32>, vector<4x4xf32> -> vector<4x4xf32>
    %cst_10 = arith.constant 3.125000e-02 : f32
    %11 = vector.broadcast %cst_10 : f32 to vector<4x4xf32>
    %12 = arith.mulf %10, %11 : vector<4x4xf32>
    %cst_11 = arith.constant 9.99999974E-6 : f32
    %13 = vector.broadcast %cst_11 : f32 to vector<4x4xf32>
    %14 = arith.addf %12, %13 : vector<4x4xf32>
    %15 = math.rsqrt %14 : vector<4x4xf32>
    %cst_12 = arith.constant dense<0.000000e+00> : vector<4x128xf32>
    %16 = tpu.matmul %15, %3, %cst_12 {dimension_numbers = #tpu.dot_dimension_numbers<[1], [0], [0], [1], [0, 0, 1, 1], [], []>} : vector<4x4xf32>, vector<4x128xf32>, vector<4x128xf32> -> vector<4x128xf32>
    %17 = arith.mulf %8, %16 : vector<4x128xf32>
    %18 = vector.broadcast %1 : vector<1x128xf32> to vector<4x128xf32>
    %19 = arith.mulf %17, %18 : vector<4x128xf32>
    %c0_13 = arith.constant 0 : index
    %c0_14 = arith.constant 0 : index
    %20 = vector.load %arg5[%c0_13, %c0_14] : memref<4x128xf32, #tpu.memory_space<vmem>>, vector<4x128xf32>
    tpu.vector_store %arg5[%c0_13, %c0_14], %19 {strides = array<i32>} : memref<4x128xf32, #tpu.memory_space<vmem>>, vector<4x128xf32>,
    return
  }
  func.func @transform_0(%arg0: i32) -> (i32, i32) {
    %c0_i32 = arith.constant 0 : i32
    %c0_i32_0 = arith.constant 0 : i32
    return %arg0, %c0_i32 : i32, i32
  }
  func.func @transform_1(%arg0: i32) -> (i32, i32) {
    %c0_i32 = arith.constant 0 : i32
    %c0_i32_0 = arith.constant 0 : i32
    %c0_i32_1 = arith.constant 0 : i32
    return %c0_i32, %c0_i32_0 : i32, i32
  }
  func.func @transform_2(%arg0: i32) -> (i32, i32) {
    %c0_i32 = arith.constant 0 : i32
    %c0_i32_0 = arith.constant 0 : i32
    %c0_i32_1 = arith.constant 0 : i32
    return %c0_i32, %c0_i32_0 : i32, i32
  }
  func.func @transform_3(%arg0: i32) -> (i32, i32) {
    %c0_i32 = arith.constant 0 : i32
    %c0_i32_0 = arith.constant 0 : i32
    %c0_i32_1 = arith.constant 0 : i32
    return %c0_i32, %c0_i32_0 : i32, i32
  }
  func.func @transform_4(%arg0: i32) -> (i32, i32) {
    %c0_i32 = arith.constant 0 : i32
    %c0_i32_0 = arith.constant 0 : i32
    return %arg0, %c0_i32 : i32, i32
  }
}

</mosaic_0001>

<bundles_post_ra>
// kernel: tpu_custom_call.1
= control target key start
LH: loop header
LB: loop body
LE: loop exit
PB: predicated region body
PF: predicated region fallthrough
CT: control target
= control target key end

     0   :  { %v507_v1 = vmov 0.0   ;;  %vm508_vm0 = vmmov 0   ;;  %s651_s0 = inlined_call_operand.vmem [shape: f32[4,128], index: 0, kind: input, shape index: {}]   ;;  %s652_s1 = inlined_call_operand.vmem [shape: f32[1,128], index: 1, kind: input, shape index: {}]   ;;  %s653_s2 = inlined_call_operand.vmem [shape: f32[128,4], index: 2, kind: input, shape index: {}]   ;;  %s654_s3 = inlined_call_operand.vmem [shape: f32[4,128], index: 3, kind: input, shape index: {}]   ;;  %s655_s4 = inlined_call_operand.hbm [shape: f32[4,128], index: 4, kind: output, shape index: {}]  }
   0x1   :  { %v538_v0 = vld [vmem:[%s653_s2 + $0x78] sm:$0xff]  ;;  %400 = vmatprep.subr.mxu0 %v507_v1  ;;  %v544_v2 = vld [vmem:[%s653_s2 + $0x70] sm:$0xff]  ;;  %432 = vmatprep.mubr.msk.f32.mxu0 %vm508_vm0, %v507_v1  ;;  %v554_v3 = vld [vmem:[%s653_s2 + $0x68] sm:$0xff] }
   0x2   :  { %401 = vmatpush3.msra.mxu0 %v538_v0  ;;  %435 = vmatprep.subr.mxu1 %v507_v1  ;;  %v32_v4 = vld [vmem:[%s653_s2 + $0x60] sm:$0xff] }
   0x3   :  { %402 = vmatprep.subr.mxu0 %v507_v1  ;;  %437 = vmatprep.mubr.msk.f32.mxu1 %vm508_vm0, %v507_v1 }
   0x4   :  { %403 = vmatpush3.msra.mxu0 %v544_v2 }
   0x5   :  { %404 = vmatprep.subr.mxu0 %v507_v1 }
   0x6   :  { %9 = vsyncpa [#allocation3], 0  ;;  %405 = vmatpush3.msra.mxu0 %v554_v3  ;;  %v31_v5 = vld [vmem:[%s653_s2 + $0x58] sm:$0xff]  ;;  %v30_v6 = vld [vmem:[%s653_s2 + $0x50] sm:$0xff]  ;;  %vm112_vm1 = vcmask 1043456   ;;  %vm108_vm2 = vcmask 31744  }
   0x7   :  { %406 = vmatprep.subr.mxu0 %v507_v1  ;;  %v29_v7 = vld [vmem:[%s653_s2 + $0x48] sm:$0xff]  ;;  %v28_v8 = vld [vmem:[%s653_s2 + $0x40] sm:$0xff]  ;;  %v27_v9 = vld [vmem:[%s653_s2 + $0x38] sm:$0xff] }
   0x8   :  { %407 = vmatpush3.msra.mxu0 %v32_v4  ;;  %v26_v10 = vld [vmem:[%s653_s2 + $0x30] sm:$0xff]  ;;  %v25_v11 = vld [vmem:[%s653_s2 + $0x28] sm:$0xff]  ;;  %v24_v12 = vld [vmem:[%s653_s2 + $0x20] sm:$0xff] }
   0x9   :  { %408 = vmatprep.subr.mxu0 %v507_v1  ;;  %v23_v13 = vld [vmem:[%s653_s2 + $0x18] sm:$0xff]  ;;  %v22_v14 = vld [vmem:[%s653_s2 + $0x10] sm:$0xff]  ;;  %v21_v15 = vld [vmem:[%s653_s2 + $0x8] sm:$0xff] }
   0xa   :  { %409 = vmatpush3.msra.mxu0 %v31_v5  ;;  %v20_v16 = vld [vmem:[%s653_s2] sm:$0xff] }
   0xb   :  { %410 = vmatprep.subr.mxu0 %v507_v1  ;;  %v18_v17 = vld [vmem:[%s651_s0] sm:$0xf] }
   0xc   :  { %411 = vmatpush3.msra.mxu0 %v30_v6  ;;  %v36_v18 = vld [vmem:[%s654_s3] sm:$0xf]  ;;  %s509_s3 = smov [#allocation2]  }
   0xd   :  { %412 = vmatprep.subr.mxu0 %v507_v1  ;;  %436 = vmatpush3.msk.msra.mxu1 %vm112_vm1, %v36_v18  ;;  %v361_v32 = vld [vmem:[%s652_s1] ss:$0 sm:$0xff]  ;;  %s349_s25 = sshll.u32 %s509_s3, 4  ;;  %s350_s25 = int_to_ptr.vmem [resolvable:$true] %s349_s25 }
   0xe   :  { %413 = vmatpush3.msra.mxu0 %v29_v7  ;;  %440 = vmatprep.subr.mxu1 %v507_v1  ;;  %s485_s26 = scalar_lea.vmem %s350_s25, 64  ;;  %p490_p1 = scmp.lt.s32.totalorder %s350_s25, %s350_s25 }
   0xf   :  { %414 = vmatprep.subr.mxu0 %v507_v1  ;;  %p486_p0 = scmp.ne.s32.totalorder %s350_s25, %s485_s26  ;;  %p491_p2 = scmp.lt.s32.totalorder %s485_s26, %s485_s26 }
  0x10   :  { %415 = vmatpush3.msra.mxu0 %v28_v8 }
  0x11   :  { %416 = vmatprep.subr.mxu0 %v507_v1  ;;  %p492_p3 = por %p491_p2, %p490_p1 }
  0x12   :  { %417 = vmatpush3.msra.mxu0 %v27_v9 }
  0x13   :  { %418 = vmatprep.subr.mxu0 %v507_v1  ;;  %p493_p4 = pnand %p492_p3, %p486_p0 }
  0x14   :  { %419 = vmatpush3.msra.mxu0 %v26_v10 }
  0x15   :  { %420 = vmatprep.subr.mxu0 %v507_v1 }
  0x16   :  { %421 = vmatpush3.msra.mxu0 %v25_v11 }
  0x17   :  { %422 = vmatprep.subr.mxu0 %v507_v1 }
  0x18   :  { %423 = vmatpush3.msra.mxu0 %v24_v12 }
  0x19   :  { %424 = vmatprep.subr.mxu0 %v507_v1 }
  0x1a   :  { %425 = vmatpush3.msra.mxu0 %v23_v13 }
  0x1b   :  { %426 = vmatprep.subr.mxu0 %v507_v1 }
  0x1c   :  { %427 = vmatpush3.msra.mxu0 %v22_v14 }
  0x1d   :  { %428 = vmatprep.subr.mxu0 %v507_v1 }
  0x1e   :  { %429 = vmatpush3.msra.mxu0 %v21_v15 }
  0x1f   :  { %430 = vmatprep.subr.mxu0 %v507_v1 }
  0x20   :  { %431 = vmatpush3.msra.mxu0 %v20_v16 }
  0x21   :  { %433 = vmatmul.mubr.f32.vlgmr.msra.gmra.mxu0 %v18_v17  ;;  %475 = vmatprep.subr.mxu0 %v507_v1 }
  0x22   :  { %477 = vmatprep.mubr.msk.f32.mxu0 %vm508_vm0, %v507_v1  ;;  %476 = vmatpush3.msk.msra.mxu0 %vm112_vm1, %v36_v18 }
  0xe1   :  { %v103_v19 = vpop.f32.mrf.mxu0 }
  0xe2   :  { %v107_v20 = vmul.f32 0.03125, %v103_v19 }
  0xe3   :  { %v434_v21 = vpop.f32.mrf.mxu0 }
  0xe4   :  { %438 = vmatmul.mubr.msk.f32.vlgmr.msra.gmra.mxu1 %vm108_vm2, %v107_v20 }
  0xe5   :  { %441 = vmatpush3.msra.mxu1 %v538_v0  ;;  %472 = vmatprep.mubr.msk.f32.mxu1 %vm508_vm0, %v507_v1 }
  0xe6   :  { %442 = vmatprep.subr.mxu1 %v507_v1 }
  0xe7   :  { %443 = vmatpush3.msra.mxu1 %v544_v2 }
  0xe8   :  { %444 = vmatprep.subr.mxu1 %v507_v1 }
  0xe9   :  { %445 = vmatpush3.msra.mxu1 %v554_v3 }
  0xea   :  { %446 = vmatprep.subr.mxu1 %v507_v1 }
  0xeb   :  { %447 = vmatpush3.msra.mxu1 %v32_v4 }
  0xec   :  { %448 = vmatprep.subr.mxu1 %v507_v1 }
  0xed   :  { %449 = vmatpush3.msra.mxu1 %v31_v5 }
  0xee   :  { %450 = vmatprep.subr.mxu1 %v507_v1 }
  0xef   :  { %451 = vmatpush3.msra.mxu1 %v30_v6 }
  0xf0   :  { %452 = vmatprep.subr.mxu1 %v507_v1 }
  0xf1   :  { %453 = vmatpush3.msra.mxu1 %v29_v7 }
  0xf2   :  { %454 = vmatprep.subr.mxu1 %v507_v1 }
  0xf3   :  { %455 = vmatpush3.msra.mxu1 %v28_v8 }
  0xf4   :  { %456 = vmatprep.subr.mxu1 %v507_v1 }
  0xf5   :  { %457 = vmatpush3.msra.mxu1 %v27_v9 }
  0xf6   :  { %458 = vmatprep.subr.mxu1 %v507_v1 }
  0xf7   :  { %459 = vmatpush3.msra.mxu1 %v26_v10 }
  0xf8   :  { %460 = vmatprep.subr.mxu1 %v507_v1 }
  0xf9   :  { %461 = vmatpush3.msra.mxu1 %v25_v11 }
  0xfa   :  { %462 = vmatprep.subr.mxu1 %v507_v1 }
  0xfb   :  { %463 = vmatpush3.msra.mxu1 %v24_v12 }
  0xfc   :  { %464 = vmatprep.subr.mxu1 %v507_v1 }
  0xfd   :  { %465 = vmatpush3.msra.mxu1 %v23_v13 }
  0xfe   :  { %466 = vmatprep.subr.mxu1 %v507_v1 }
  0xff   :  { %467 = vmatpush3.msra.mxu1 %v22_v14 }
 0x100   :  { %468 = vmatprep.subr.mxu1 %v507_v1 }
 0x101   :  { %469 = vmatpush3.msra.mxu1 %v21_v15 }
 0x102   :  { %470 = vmatprep.subr.mxu1 %v507_v1 }
 0x103   :  { %471 = vmatpush3.msra.mxu1 %v20_v16 }
 0x1a4   :  { %v182_v22 = vpop.f32.mrf.mxu1 }
 0x1a5   :  { %v186_v23 = vsub.f32 %v18_v17, %v182_v22 }
 0x1a6   :  { %v439_v24 = vpop.f32.mrf.mxu1 }
 0x1a7   :  { %v187_v25 = vmul.f32 %v186_v23, %v186_v23 }
 0x1a9   :  { %473 = vmatmul.mubr.f32.vlgmr.msra.gmra.mxu1 %v187_v25 }
 0x269   :  { %v254_v26 = vpop.f32.mrf.mxu1 }
 0x26a   :  { %v258_v27 = vmul.f32 0.03125, %v254_v26 }
 0x26b   :  { %v474_v28 = vpop.f32.mrf.mxu1 }
 0x26c   :  { %v259_v29 = vadd.f32 1e-05, %v258_v27 }
 0x26e   :  { %483 = vrsqrt.f32 %v259_v29 }
 0x27b   :  { %v484_v30 = vpop.eup %483 }
 0x27c   :  { %478 = vmatmul.mubr.msk.f32.vlgmr.msra.gmra.mxu0 %vm108_vm2, %v484_v30 }
 0x33c   :  { %v330_v31 = vpop.f32.mrf.mxu0 }
 0x33d   :  { %v334_v33 = vmul.f32 %v330_v31, %v186_v23 }
 0x33e   :  { %v479_v34 = vpop.f32.mrf.mxu0 }
 0x33f   :  { %v341_v35 = vmul.f32 %v361_v32, %v334_v33 }
 0x341   :  { %342 = vst [vmem:[#allocation2] sm:$0xf] %v341_v35 }
 0x342   :  { %496 = shalt.err (!%p493_p4)
}
 0x343   :  { %352 = dma.vmem_to_hbm [thread:$0]  %s350_s25, 64, %s655_s4, [#allocation3]  }
 0x344   :  { %505 = dma.done.wait [#allocation3], 64  }
 0x345   :  { %506 = vsyncadd [#allocation3], 4294967232 }
 0x346   :  { %356 = vsyncpa [#allocation3], 1 }

</bundles_post_ra>
